<compile_context>
chip_gen: v5e
topology: v5e:2x2
jax: 0.10.0
libtpu: 0.0.40
codegen_flags: <defaults>
</compile_context>

<pallas_src>
import functools

import jax
import jax.numpy as jnp
from jax import lax
from jax.experimental import pallas as pl
from jax.experimental.pallas import tpu as pltpu


def _round_up(x, m):
    return (x + m - 1) // m * m


# ----------------------------- Pallas kernels --------------------------------
def linear_bn_relu_kernel_nosplit(x_ref, w_ref, b_ref, o_ref):
    """Single-K-tile fast path: dot + folded bias + ReLU, no scratch.

    x_ref: (tm, tk) bf16   w_ref: (tk, tn) bf16   b_ref: (1, tn) f32
    o_ref: (tm, tn)
    """
    y = jnp.dot(x_ref[...], w_ref[...], preferred_element_type=jnp.float32)
    y = y + b_ref[...]
    o_ref[...] = jnp.maximum(y, 0.0).astype(o_ref.dtype)


def linear_bn_relu_kernel_ksplit(x_ref, w_ref, b_ref, o_ref, acc_ref):
    """General path: K-tiled matmul with f32 accumulator seeded by the bias.

    acc_ref persists across the trailing K grid axis (same output block).
    """
    @pl.when(pl.program_id(2) == 0)
    def _():
        # Seed the accumulator with the folded bias (broadcast over sublanes)
        # so the epilogue is just ReLU + cast.
        acc_ref[...] = jnp.broadcast_to(b_ref[...], acc_ref.shape)

    acc_ref[...] += jnp.dot(x_ref[...], w_ref[...],
                            preferred_element_type=jnp.float32)

    @pl.when(pl.program_id(2) == pl.num_programs(2) - 1)
    def _():
        o_ref[...] = jnp.maximum(acc_ref[...], 0.0).astype(o_ref.dtype)


# ------------------------------ wrapper ---------------------------------------
@functools.partial(jax.jit, static_argnames=("eps", "tm", "tn", "tk"))
def linear_block_forward(x, weight, bias, bn_gamma, bn_beta, bn_mean, bn_var,
                         eps=1e-5, tm=256, tn=256, tk=512):
    """LinearBlock.forward.  x: (batch, in_channels), weight: (out, in)."""
    M, K = x.shape
    N = weight.shape[0]
    f32 = jnp.float32

    # Fold BatchNorm1d (eval mode) into the linear layer:
    #   (x @ W^T + b) * scale + shift == x @ (W^T * scale) + (b * scale + shift)
    scale = bn_gamma.astype(f32) * lax.rsqrt(bn_var.astype(f32) + eps)   # (N,)
    shift = bn_beta.astype(f32) - bn_mean.astype(f32) * scale            # (N,)
    w_folded = weight.astype(f32).T * scale[None, :]                     # (K, N)
    b_folded = bias.astype(f32) * scale + shift                          # (N,)

    # bf16 operands for the MXU; accumulation / epilogue stay f32.
    x_mxu = x.astype(jnp.bfloat16)
    w_mxu = w_folded.astype(jnp.bfloat16)

    # Pad to (8, 128)-friendly shapes so output stores are lane-dense and
    # unmasked; cap tile sizes to the padded problem.
    Mp = _round_up(M, 8)
    Kp = _round_up(K, 128)
    Np = _round_up(N, 128)
    tm = min(tm, Mp)
    tk = min(tk, Kp)
    tn = min(tn, Np)
    Mp = _round_up(Mp, tm)
    Kp = _round_up(Kp, tk)
    Np = _round_up(Np, tn)

    x_p = jnp.pad(x_mxu, ((0, Mp - M), (0, Kp - K)))
    w_p = jnp.pad(w_mxu, ((0, Kp - K), (0, Np - N)))
    b_p = jnp.pad(b_folded, ((0, Np - N),)).reshape(1, Np)

    k_tiles = Kp // tk

    if k_tiles == 1:
        # Fast path: no reduction axis, no accumulator scratch.
        out = pl.pallas_call(
            linear_bn_relu_kernel_nosplit,
            out_shape=jax.ShapeDtypeStruct((Mp, Np), x.dtype),
            grid_spec=pltpu.PrefetchScalarGridSpec(
                num_scalar_prefetch=0,
                grid=(Mp // tm, Np // tn),
                in_specs=[
                    pl.BlockSpec((tm, tk), lambda i, j: (i, 0)),
                    pl.BlockSpec((tk, tn), lambda i, j: (0, j)),
                    pl.BlockSpec((1, tn), lambda i, j: (0, j)),
                ],
                out_specs=pl.BlockSpec((tm, tn), lambda i, j: (i, j)),
            ),
            compiler_params=pltpu.CompilerParams(
                dimension_semantics=("parallel", "parallel")),
        )(x_p, w_p, b_p)
    else:
        out = pl.pallas_call(
            linear_bn_relu_kernel_ksplit,
            out_shape=jax.ShapeDtypeStruct((Mp, Np), x.dtype),
            grid_spec=pltpu.PrefetchScalarGridSpec(
                num_scalar_prefetch=0,
                grid=(Mp // tm, Np // tn, k_tiles),
                in_specs=[
                    pl.BlockSpec((tm, tk), lambda i, j, k: (i, k)),
                    pl.BlockSpec((tk, tn), lambda i, j, k: (k, j)),
                    pl.BlockSpec((1, tn), lambda i, j, k: (0, j)),
                ],
                out_specs=pl.BlockSpec((tm, tn), lambda i, j, k: (i, j)),
                scratch_shapes=[pltpu.VMEM((tm, tn), jnp.float32)],
            ),
            compiler_params=pltpu.CompilerParams(
                dimension_semantics=("parallel", "parallel", "arbitrary")),
        )(x_p, w_p, b_p)

    return out[:M, :N]


# ----------------------------- reference --------------------------------------
def linear_block_reference(x, weight, bias, bn_gamma, bn_beta, bn_mean, bn_var,
                           eps=1e-5):
    y = x.astype(jnp.float32) @ weight.astype(jnp.float32).T + bias
    scale = bn_gamma * lax.rsqrt(bn_var + eps)
    y = (y - bn_mean) * scale + bn_beta
    return jnp.maximum(y, 0.0)


# ------------------------------- main ------------------------------------------
if __name__ == "__main__":
    key = jax.random.PRNGKey(0)
    k_x, k_w, k_b, k_g, k_bb, k_m, k_v = jax.random.split(key, 7)

    batch, in_channels, out_channels = 16, 32, 64

    x = jax.random.normal(k_x, (batch, in_channels), dtype=jnp.float32)

    # Deterministic "kaiming_normal_" linear weight: std = sqrt(2 / fan_in).
    w = jax.random.normal(k_w, (out_channels, in_channels),
                          dtype=jnp.float32) * jnp.sqrt(2.0 / in_channels)
    # init.normal_ bias.
    b = jax.random.normal(k_b, (out_channels,), dtype=jnp.float32)

    # BatchNorm1d parameters (deterministic, eval-mode running stats).
    bn_gamma = 1.0 + 0.1 * jax.random.normal(k_g, (out_channels,), jnp.float32)
    bn_beta = 0.1 * jax.random.normal(k_bb, (out_channels,), jnp.float32)
    bn_mean = 0.1 * jax.random.normal(k_m, (out_channels,), jnp.float32)
    bn_var = 1.0 + 0.1 * jnp.abs(jax.random.normal(k_v, (out_channels,),
                                                   jnp.float32))

    out = linear_block_forward(x, w, b, bn_gamma, bn_beta, bn_mean, bn_var)
    out = jax.block_until_ready(out)

    ref = linear_block_reference(x, w, b, bn_gamma, bn_beta, bn_mean, bn_var)
    assert out.shape == (batch, out_channels)
    # bf16 MXU operands vs f32 reference -> loose-ish tolerance.
    assert jnp.allclose(out, ref, atol=5e-2, rtol=5e-2), (
        float(jnp.max(jnp.abs(out - ref))))

    print("KERNEL_OK")
</pallas_src>

<mosaic_0001>
module attributes {stable_mosaic.version = 11 : i64} {
  func.func @linear_bn_relu_kernel_nosplit(%arg0: i32, %arg1: i32, %arg2: memref<16x128xbf16, #tpu.memory_space<vmem>>, %arg3: memref<128x128xbf16, #tpu.memory_space<vmem>>, %arg4: memref<1x128xf32, #tpu.memory_space<vmem>>, %arg5: memref<16x128xf32, #tpu.memory_space<vmem>>) attributes {dimension_semantics = [#tpu.dimension_semantics<parallel>, #tpu.dimension_semantics<parallel>], iteration_bounds = array<i64: 1, 1>, scalar_prefetch = 0 : i64, scratch_operands = 0 : i64, tpu.core_type = #tpu.core_type<tc>, window_params = [{transform_indices = @transform_0, window_bounds = array<i64: 16, 128>}, {transform_indices = @transform_1, window_bounds = array<i64: 128, 128>}, {transform_indices = @transform_2, window_bounds = array<i64: 1, 128>}, {transform_indices = @transform_3, window_bounds = array<i64: 16, 128>}]} {
    %c0 = arith.constant 0 : index
    %c0_0 = arith.constant 0 : index
    %0 = vector.load %arg2[%c0, %c0_0] : memref<16x128xbf16, #tpu.memory_space<vmem>>, vector<16x128xbf16>
    %c0_1 = arith.constant 0 : index
    %c0_2 = arith.constant 0 : index
    %1 = vector.load %arg3[%c0_1, %c0_2] : memref<128x128xbf16, #tpu.memory_space<vmem>>, vector<128x128xbf16>
    %cst = arith.constant dense<0.000000e+00> : vector<16x128xf32>
    %2 = tpu.matmul %0, %1, %cst {dimension_numbers = #tpu.dot_dimension_numbers<[1], [0], [0], [1], [0, 0, 1, 1], [], []>} : vector<16x128xbf16>, vector<128x128xbf16>, vector<16x128xf32> -> vector<16x128xf32>
    %c0_3 = arith.constant 0 : index
    %c0_4 = arith.constant 0 : index
    %3 = vector.load %arg4[%c0_3, %c0_4] : memref<1x128xf32, #tpu.memory_space<vmem>>, vector<1x128xf32>
    %4 = vector.broadcast %3 : vector<1x128xf32> to vector<16x128xf32>
    %5 = arith.addf %2, %4 : vector<16x128xf32>
    %cst_5 = arith.constant 0.000000e+00 : f32
    %6 = vector.broadcast %cst_5 : f32 to vector<16x128xf32>
    %7 = arith.maximumf %5, %6 : vector<16x128xf32>
    %c0_6 = arith.constant 0 : index
    %c0_7 = arith.constant 0 : index
    %8 = vector.load %arg5[%c0_6, %c0_7] : memref<16x128xf32, #tpu.memory_space<vmem>>, vector<16x128xf32>
    tpu.vector_store %arg5[%c0_6, %c0_7], %7 {strides = array<i32>} : memref<16x128xf32, #tpu.memory_space<vmem>>, vector<16x128xf32>,
    return
  }
  func.func @transform_0(%arg0: i32, %arg1: i32) -> (i32, i32) {
    %c0_i32 = arith.constant 0 : i32
    %c0_i32_0 = arith.constant 0 : i32
    return %arg0, %c0_i32 : i32, i32
  }
  func.func @transform_1(%arg0: i32, %arg1: i32) -> (i32, i32) {
    %c0_i32 = arith.constant 0 : i32
    %c0_i32_0 = arith.constant 0 : i32
    return %c0_i32, %arg1 : i32, i32
  }
  func.func @transform_2(%arg0: i32, %arg1: i32) -> (i32, i32) {
    %c0_i32 = arith.constant 0 : i32
    %c0_i32_0 = arith.constant 0 : i32
    return %c0_i32, %arg1 : i32, i32
  }
  func.func @transform_3(%arg0: i32, %arg1: i32) -> (i32, i32) {
    %c0_i32 = arith.constant 0 : i32
    return %arg0, %arg1 : i32, i32
  }
}

</mosaic_0001>

<bundles_post_ra>
// kernel: linear_block_forward.1
= control target key start
LH: loop header
LB: loop body
LE: loop exit
PB: predicated region body
PF: predicated region fallthrough
CT: control target
= control target key end

     0   :  { %s258_s0 = inlined_call_operand.vmem [shape: bf16[16,128], index: 0, kind: input, shape index: {}]   ;;  %s259_s1 = inlined_call_operand.vmem [shape: bf16[128,128], index: 1, kind: input, shape index: {}]   ;;  %s260_s2 = inlined_call_operand.vmem [shape: f32[1,128], index: 2, kind: input, shape index: {}]   ;;  %s261_s3 = inlined_call_operand.hbm [shape: f32[16,128], index: 3, kind: output, shape index: {}]  }
   0x1   :  { %v171_v0 = vld [vmem:[%s259_s1 + $0x38] sm:$0xff]  ;;  %v170_v1 = vld [vmem:[%s259_s1 + $0x30] sm:$0xff] }
   0x2   :  { %91 = vmatpush.bf16.msra.mxu0 %v171_v0 }
   0x3   :  { %8 = vsyncpa [#allocation3], 0  ;;  %v169_v2 = vld [vmem:[%s259_s1 + $0x28] sm:$0xff]  ;;  %v168_v3 = vld [vmem:[%s259_s1 + $0x20] sm:$0xff]  ;;  %s202_s5 = smov [#allocation2]   ;;  %s204_s9 = smov 8  }
   0x4   :  { %v167_v4 = vld [vmem:[%s259_s1 + $0x18] sm:$0xff]  ;;  %v166_v5 = vld [vmem:[%s259_s1 + $0x10] sm:$0xff]  ;;  %v165_v6 = vld [vmem:[%s259_s1 + $0x8] sm:$0xff]  ;;  %s113_s6 = sshll.u32 %s202_s5, 4  ;;  %s114_s6 = int_to_ptr.vmem [resolvable:$true] %s113_s6 }
   0x5   :  { %v164_v7 = vld [vmem:[%s259_s1] sm:$0xff]  ;;  %s115_s1 = sshll.u32 %s261_s3, 4  ;;  %s116_s1 = int_to_ptr.hbm [resolvable:$true] %s115_s1 }
   0x6   :  { %92 = vmatpush.bf16.msra.mxu0 %v170_v1  ;;  %v163_v8 = vld [vmem:[%s258_s0] sm:$0xff]  ;;  %s203_s0 = smov 128  }
   0x7   :  { %v175_v9 = vld [vmem:[%s260_s2] ss:$0 sm:$0xff] }
   0xa   :  { %93 = vmatpush.bf16.msra.mxu0 %v169_v2 }
   0xe   :  { %94 = vmatpush.bf16.msra.mxu0 %v168_v3 }
  0x12   :  { %95 = vmatpush.bf16.msra.mxu0 %v167_v4 }
  0x16   :  { %96 = vmatpush.bf16.msra.mxu0 %v166_v5 }
  0x1a   :  { %97 = vmatpush.bf16.msra.mxu0 %v165_v6 }
  0x1e   :  { %98 = vmatpush.bf16.msra.mxu0 %v164_v7 }
  0x21   :  { %99 = vmatmul.bf16.vlgmr.msra.gmra.mxu0 %v163_v8 }
  0x9e   :  { %v100_v10 = vpop.f32.mrf.mxu0 }
  0x9f   :  { %v101_v11 = vadd.f32 %v175_v9, %v100_v10 }
  0xa1   :  { %v105_v12 = vmax.f32 %v101_v11, 0.0 }
  0xa3   :  { %107 = vst [vmem:[#allocation2] sm:$0xff] %v105_v12 }
  0xa6   :  { %v102_v13 = vpop.f32.mrf.mxu0 }
  0xa7   :  { %v103_v14 = vadd.f32 %v175_v9, %v102_v13 }
  0xa9   :  { %v106_v15 = vmax.f32 %v103_v14, 0.0 }
  0xab   :  { %108 = vst [vmem:[#allocation2 + $0x8] sm:$0xff] %v106_v15 }
  0xac   :  { %121 = dma.vmem_to_hbm [thread:$0]  %s114_s6, 256, %s116_s1, [#allocation3], %s203_s0, %s203_s0, %s204_s9  }
  0xad   :  { %200 = dma.done.wait [#allocation3], 256  }
  0xae   :  { %201 = vsyncadd [#allocation3], 4294967040 }
  0xaf   :  { %126 = vsyncpa [#allocation3], 1 }

</bundles_post_ra>
